<compile_context>
chip_gen: v5e
topology: v5e:2x2
jax: 0.10.0
libtpu: 0.0.40
codegen_flags: <defaults>
</compile_context>

<pallas_src>
import functools

import jax
import jax.numpy as jnp
from jax.experimental import pallas as pl
from jax.experimental.pallas import tpu as pltpu

# TODO(synk): query the real TensorCore count (pltpu.get_tpu_info) instead of
# assuming 2; the extra (fully masked) steps on 1-TC chips are negligible.
_NCORES = 2
_LANE = 128
_SUBLANE = 8


def _round_up(v, m):
    return ((v + m - 1) // m) * m


def _hloss_kernel(x_ref, out_ref, *, nt, tb, rb, nsub, n_valid_rows):
    c = pl.program_id(0)
    t = pl.program_id(1)

    # Zero this core's SMEM partial on its first reduction step.
    @pl.when(t == 0)
    def _():
        out_ref[0, 0] = 0.0

    # Unclamped grid position: duplicate (clamped) blocks and padded trailing
    # rows land at row0 >= n_valid_rows and are fully masked below.
    row0 = (c * nt + t) * tb

    def body(i, acc):
        start = pl.multiple_of(i * rb, rb)
        xb = x_ref[pl.ds(start, rb), :]                       # (rb, C) native dtype
        m = jnp.max(xb, axis=1, keepdims=True)                # exact also for bf16
        z = xb.astype(jnp.float32) - m.astype(jnp.float32)    # single upcast
        e = jnp.exp(z)                                        # one exp / element
        s = jnp.sum(e, axis=1, keepdims=True)
        sez = jnp.sum(e * z, axis=1, keepdims=True)
        # -sum(softmax * log_softmax) per row == log(s) - sum(e*z)/s
        ent = jnp.log(s) - sez / s                            # (rb, 1) f32
        rows = row0 + start + jax.lax.broadcasted_iota(jnp.int32, (rb, 1), 0)
        return acc + jnp.where(rows < n_valid_rows, ent, 0.0)

    acc = jax.lax.fori_loop(0, nsub, body,
                            jnp.zeros((rb, 1), jnp.float32), unroll=True)
    out_ref[0, 0] += jnp.sum(acc)


def hloss(x, *, target_tile_bytes=8 * 1024 * 1024, sub_rows=128):
    """Entropy loss: -sum(softmax(x,1) * log_softmax(x,1)). Returns scalar f32."""
    assert x.ndim == 2, "kernel expects (B, C) logits (softmax over dim=1)"
    B, C = x.shape
    itemsize = jnp.dtype(x.dtype).itemsize
    c_vmem = _round_up(C, _LANE)  # lane-padded width (VMEM sizing only)

    # ---- Row-tile size (DMA granularity) and in-tile sub-block size -------
    if B < _SUBLANE:
        tb = B          # block dim == full array dim (always legal)
        rb = B
    else:
        rows_fit = max(_SUBLANE, target_tile_bytes // (c_vmem * itemsize))
        tb = min(rows_fit, (B // _SUBLANE) * _SUBLANE)   # keep block rows <= B
        tb = max(_SUBLANE, (tb // _SUBLANE) * _SUBLANE)
        if tb >= sub_rows:
            tb = (tb // sub_rows) * sub_rows
            rb = sub_rows
        else:
            rb = tb
    nsub = tb // rb

    total_blocks = pl.cdiv(B, tb)
    ncores = min(_NCORES, total_blocks)
    nt = pl.cdiv(total_blocks, ncores)
    last_block = total_blocks - 1

    kernel = functools.partial(_hloss_kernel, nt=nt, tb=tb, rb=rb,
                               nsub=nsub, n_valid_rows=B)

    # Double-buffered input tile + small sub-block intermediates.  Capped at
    # 64 MiB so the same choice is safe on v7x (64 MiB physical VMEM).
    tile_bytes = tb * c_vmem * itemsize
    vmem_limit = int(min(64 * 1024 * 1024,
                         max(32 * 1024 * 1024, 2 * tile_bytes + 8 * 1024 * 1024)))

    partials = pl.pallas_call(
        kernel,
        out_shape=jax.ShapeDtypeStruct((ncores, 1), jnp.float32),
        grid_spec=pltpu.PrefetchScalarGridSpec(
            num_scalar_prefetch=0,
            grid=(ncores, nt),
            in_specs=[
                # Full last dim => no lane padding of the HBM array; clamp the
                # block index so over-provisioned steps re-read a valid block
                # (their contribution is masked out via row0 in the kernel).
                pl.BlockSpec(
                    (tb, C),
                    lambda c, t: (jnp.minimum(c * nt + t, last_block), 0)),
            ],
            out_specs=pl.BlockSpec(
                (1, 1), lambda c, t: (c, 0),
                memory_space=pltpu.MemorySpace.SMEM,
            ),
        ),
        compiler_params=pltpu.CompilerParams(
            dimension_semantics=("parallel", "arbitrary"),
            vmem_limit_bytes=vmem_limit,
        ),
        cost_estimate=pl.CostEstimate(
            flops=6 * B * C,
            transcendentals=B * C + B,
            bytes_accessed=B * C * itemsize + ncores * 4,
        ),
    )(x)

    # Sum the per-core partials (2 on v7x, trivially cheap everywhere).
    return jnp.sum(partials)


def _ref(x):
    logp = jax.nn.log_softmax(x, axis=1)
    return -jnp.sum(jnp.exp(logp) * logp)


if __name__ == "__main__":
    key = jax.random.PRNGKey(0)
    k1, k2, k3 = jax.random.split(key, 3)

    # (batch, classes) — small shapes consistent with the module.
    x1 = jax.random.normal(k1, (8, 32), dtype=jnp.float32)
    r1 = jax.block_until_ready(hloss(x1))
    assert jnp.allclose(r1, _ref(x1), rtol=1e-5, atol=1e-5), (r1, _ref(x1))

    # Exercises non-128 class dim (C=130) and ragged trailing row-block (B=33).
    x2 = jax.random.normal(k2, (33, 130), dtype=jnp.float32)
    r2 = jax.block_until_ready(hloss(x2))
    assert jnp.allclose(r2, _ref(x2), rtol=1e-5, atol=1e-5), (r2, _ref(x2))

    # bf16 path: exercises multi-sub-block tiles, the 2-way core split and the
    # native-dtype row max (reference computed in f32 on the same bf16 values).
    x3 = jax.random.normal(k3, (300, 257), dtype=jnp.float32).astype(jnp.bfloat16)
    r3 = jax.block_until_ready(hloss(x3))
    ref3 = _ref(x3.astype(jnp.float32))
    assert jnp.allclose(r3, ref3, rtol=1e-4, atol=1e-2), (r3, ref3)

    print("KERNEL_OK")
</pallas_src>

<mosaic_0001>
module attributes {stable_mosaic.version = 11 : i64} {
  func.func @_hloss_kernel(%arg0: i32, %arg1: i32, %arg2: memref<8x32xf32, #tpu.memory_space<vmem>>, %arg3: memref<1x1xf32, #tpu.memory_space<smem>>) attributes {dimension_semantics = [#tpu.dimension_semantics<parallel>, #tpu.dimension_semantics<arbitrary>], iteration_bounds = array<i64: 1, 1>, scalar_prefetch = 0 : i64, scratch_operands = 0 : i64, tpu.core_type = #tpu.core_type<tc>, window_params = [{transform_indices = @transform_0, window_bounds = array<i64: 8, 32>}, {transform_indices = @transform_1, window_bounds = array<i64: 1, 1>}]} {
    %c0_i32 = arith.constant 0 : i32
    %0 = arith.cmpi eq, %arg1, %c0_i32 : i32
    %1 = arith.extui %0 : i1 to i32
    %c0_i32_0 = arith.constant 0 : i32
    %2 = arith.cmpi ne, %1, %c0_i32_0 : i32
    scf.if %2 {
      %cst_14 = arith.constant 0.000000e+00 : f32
      %c0_15 = arith.constant 0 : index
      %c0_16 = arith.constant 0 : index
      %40 = memref.load %arg3[%c0_15, %c0_16] : memref<1x1xf32, #tpu.memory_space<smem>>
      memref.store %cst_14, %arg3[%c0_15, %c0_16] : memref<1x1xf32, #tpu.memory_space<smem>>
    } else {
    }
    %c1_i32 = arith.constant 1 : i32
    %3 = arith.muli %arg0, %c1_i32 : i32
    %4 = arith.addi %3, %arg1 : i32
    %c8_i32 = arith.constant 8 : i32
    %5 = arith.muli %4, %c8_i32 : i32
    %cst = arith.constant 0.000000e+00 : f32
    %6 = vector.broadcast %cst : f32 to vector<8x1xf32>
    %c0_i32_1 = arith.constant 0 : i32
    %c8_i32_2 = arith.constant 8 : i32
    %7 = arith.muli %c0_i32_1, %c8_i32_2 : i32
    %8 = tpu.assume_multiple %7, 8 : i32
    %9 = arith.index_cast %8 : i32 to index
    %c0 = arith.constant 0 : index
    %10 = vector.load %arg2[%9, %c0] : memref<8x32xf32, #tpu.memory_space<vmem>>, vector<8x32xf32>
    %cst_3 = arith.constant dense<0xFF800000> : vector<8xf32>
    %11 = vector.multi_reduction <maximumf>, %10, %cst_3 [1] : vector<8x32xf32> to vector<8xf32>
    %12 = vector.shape_cast %11 : vector<8xf32> to vector<8x1xf32>
    %13 = vector.broadcast %12 : vector<8x1xf32> to vector<8x32xf32>
    %14 = arith.subf %10, %13 : vector<8x32xf32>
    %15 = math.exp %14 : vector<8x32xf32>
    %cst_4 = arith.constant dense<0.000000e+00> : vector<8xf32>
    %16 = vector.multi_reduction <add>, %15, %cst_4 [1] : vector<8x32xf32> to vector<8xf32>
    %17 = vector.shape_cast %16 : vector<8xf32> to vector<8x1xf32>
    %18 = arith.mulf %15, %14 : vector<8x32xf32>
    %cst_5 = arith.constant dense<0.000000e+00> : vector<8xf32>
    %19 = vector.multi_reduction <add>, %18, %cst_5 [1] : vector<8x32xf32> to vector<8xf32>
    %20 = vector.shape_cast %19 : vector<8xf32> to vector<8x1xf32>
    %21 = math.log %17 : vector<8x1xf32>
    %22 = arith.divf %20, %17 : vector<8x1xf32>
    %23 = arith.subf %21, %22 : vector<8x1xf32>
    %24 = arith.addi %5, %8 : i32
    %25 = tpu.iota {dimensions = array<i32: 0>} : vector<8x1xi32>
    %26 = vector.broadcast %24 : i32 to vector<8x1xi32>
    %27 = arith.addi %26, %25 : vector<8x1xi32>
    %c8_i32_6 = arith.constant 8 : i32
    %28 = vector.broadcast %c8_i32_6 : i32 to vector<8x1xi32>
    %29 = arith.cmpi slt, %27, %28 : vector<8x1xi32>
    %cst_7 = arith.constant 0.000000e+00 : f32
    %30 = vector.broadcast %cst_7 : f32 to vector<8x1xf32>
    %31 = arith.select %29, %23, %30 : vector<8x1xi1>, vector<8x1xf32>
    %32 = arith.addf %6, %31 : vector<8x1xf32>
    %c1_i32_8 = arith.constant 1 : i32
    %c0_9 = arith.constant 0 : index
    %c0_10 = arith.constant 0 : index
    %33 = memref.load %arg3[%c0_9, %c0_10] : memref<1x1xf32, #tpu.memory_space<smem>>
    %34 = vector.shape_cast %32 : vector<8x1xf32> to vector<1x8x1xf32>
    %cst_11 = arith.constant dense<0.000000e+00> : vector<1xf32>
    %35 = vector.multi_reduction <add>, %34, %cst_11 [1, 2] : vector<1x8x1xf32> to vector<1xf32>
    %36 = vector.shape_cast %35 : vector<1xf32> to vector<1x1x1xf32>
    %37 = vector.extract %36[0, 0, 0] : f32 from vector<1x1x1xf32>
    %38 = arith.addf %33, %37 : f32
    %c0_12 = arith.constant 0 : index
    %c0_13 = arith.constant 0 : index
    %39 = memref.load %arg3[%c0_12, %c0_13] : memref<1x1xf32, #tpu.memory_space<smem>>
    memref.store %38, %arg3[%c0_12, %c0_13] : memref<1x1xf32, #tpu.memory_space<smem>>
    return
  }
  func.func @transform_0(%arg0: i32, %arg1: i32) -> (i32, i32) {
    %c1_i32 = arith.constant 1 : i32
    %0 = arith.muli %arg0, %c1_i32 : i32
    %1 = arith.addi %0, %arg1 : i32
    %c0_i32 = arith.constant 0 : i32
    %2 = arith.minsi %1, %c0_i32 : i32
    %c0_i32_0 = arith.constant 0 : i32
    %c0_i32_1 = arith.constant 0 : i32
    return %2, %c0_i32_0 : i32, i32
  }
  func.func @transform_1(%arg0: i32, %arg1: i32) -> (i32, i32) {
    %c0_i32 = arith.constant 0 : i32
    %c0_i32_0 = arith.constant 0 : i32
    return %arg0, %c0_i32 : i32, i32
  }
}

</mosaic_0001>

<bundles_post_ra>
// kernel: tpu_custom_call.1
= control target key start
LH: loop header
LB: loop body
LE: loop exit
PB: predicated region body
PF: predicated region fallthrough
CT: control target
= control target key end

     0   :  { %6 = vsyncpa [#allocation3], 0  ;;  %s182_s0 = inlined_call_operand.hbm [shape: f32[8,32], index: 0, kind: input, shape index: {}]   ;;  %s183_s1 = inlined_call_operand.hbm [shape: f32[1,1], index: 1, kind: output, shape index: {}]  }
   0x1   :  { %7 = vsyncpa [#allocation4], 0  ;;  %s18_s8 = sshll.u32 %s182_s0, 4  ;;  %s164_s9 = smov [#allocation2]   ;;  %s19_s8 = int_to_ptr.hbm [resolvable:$true] %s18_s8 }
   0x2   :  { %s20_s10 = sshll.u32 %s164_s9, 4  ;;  %s21_s10 = int_to_ptr.vmem [resolvable:$true] %s20_s10 }
   0x3   :  { %23 = dma.hbm_to_vmem [thread:$0]  %s19_s8, 128, %s21_s10, [#allocation3]  }
   0x4   :  { %160 = dma.done.wait [#allocation3], 128  }
   0x5   :  { %161 = vsyncadd [#allocation3], 4294967168  ;;  %vm40_vm0 = vcmask 261120   ;;  %v39_v0 = vld [vmem:[#allocation2] sm:$0xff]  ;;  %vm81_vm5 = vcmask 7168   ;;  %s100_s12 = sshll.u32 %s183_s1, 4  ;;  %s101_s12 = int_to_ptr.hbm [resolvable:$true] %s100_s12 }
   0x6   :  { %v41_v1 = vsel %vm40_vm0, %v39_v0, -inf  ;;  %s165_s14 = smov [#allocation5]  }
   0x7   :  { %42 = vmax.xlane.f32.xlu0 %v41_v1 }
  0x7a   :  { %v43_v2 = vpop.xlane.xlu0 %42 }
  0x7b   :  { %v44_v3 = vsub.f32 %v39_v0, %v43_v2 }
  0x7d   :  { %v45_v4 = vmul.f32 1.442695, %v44_v3 }
  0x7f   :  { %118 = vpow2.f32 %v45_v4 }
  0x85   :  { %v119_v5 = vpop.eup %118 }
  0x86   :  { %v47_v6 = vsel %vm40_vm0, %v119_v5, 0.0  ;;  %v50_v7 = vmul.f32 %v119_v5, %v44_v3 }
  0x87   :  { %48 = vadd.xlane.f32.xlu0 %v47_v6 }
  0x88   :  { %v51_v8 = vsel %vm40_vm0, %v50_v7, 0.0 }
  0x89   :  { %52 = vadd.xlane.f32.xlu1 %v51_v8 }
  0xfa   :  { %v49_v9 = vpop.xlane.xlu0 %48 }
  0xfb   :  { %120 = vrcp.f32 %v49_v9  ;;  %v67_v13 = vand.u32 2147483648, %v49_v9  ;;  %v65_v15 = vand.u32 2147483647, %v49_v9  ;;  %vm61_vm2 = vweird.f32 %v49_v9 }
  0xfc   :  { %122 = vlog2.f32 %v49_v9  ;;  %v53_v20 = vpop.xlane.xlu1 %52 }
  0xfd   :  { %v68_v18 = vor.u32 1.1754944e-38, %v67_v13  ;;  %vm66_vm4 = vcmp.eq.f32.partialorder %v65_v15, 8.507059e+37 }
 0x101   :  { %v121_v10 = vpop.eup %120 }
 0x102   :  { %v57_v11 = vmul.f32 %v121_v10, %v49_v9  ;;  %vm62_vm1 = vweird.f32 %v121_v10  ;;  %v123_v17 = vpop.eup %122 }
 0x103   :  { %vm63_vm3 = vmor %vm61_vm2, %vm62_vm1  ;;  %v55_v23 = vmul.f32 0.6931472, %v123_v17 }
 0x104   :  { %v58_v12 = vsub.f32 1.0, %v57_v11 }
 0x106   :  { %v59_v14 = vmul.f32 %v121_v10, %v58_v12 }
 0x108   :  { %v60_v16 = vadd.f32 %v121_v10, %v59_v14 }
 0x10a   :  { %v64_v19 = vsel %vm63_vm3, %v121_v10, %v60_v16 }
 0x10b   :  { %v69_v21 = vsel %vm66_vm4, %v68_v18, %v64_v19 }
 0x10c   :  { %v70_v22 = vmul.f32 %v69_v21, %v53_v20 }
 0x10e   :  { %v71_v24 = vsub.f32 %v55_v23, %v70_v22 }
 0x110   :  { %v82_v25 = vsel %vm81_vm5, %v71_v24, 0.0 }
 0x111   :  { %83 = vadd.xlane.f32.xlu1 %v82_v25 }
 0x184   :  { %v84_v26 = vpop.xlane.xlu1 %83 }
 0x185   :  { %v85_v27 = vrot.slane %v84_v26, 4 }
 0x187   :  { %v86_v28 = vadd.f32 %v85_v27, %v84_v26 }
 0x189   :  { %v87_v29 = vrot.slane %v86_v28, 2 }
 0x18b   :  { %v88_v30 = vadd.f32 %v87_v29, %v86_v28 }
 0x18d   :  { %v89_v31 = vrot.slane %v88_v30, 1 }
 0x18f   :  { %v90_v32 = vadd.f32 %v89_v31, %v88_v30 }
 0x191   :  { %113 = vpush %v90_v32 }
 0x1c2   :  { %s114_s13 = spop %113 }
 0x1c3   :  { %94 = sst [smem:[#allocation5]] %s114_s13 }
 0x1c4   :  { %103 = dma.smem_to_hbm %s165_s14, 16, %s101_s12, [#allocation4]  }
 0x1c5   :  { %162 = dma.done.wait [#allocation4], 16  }
 0x1c6   :  { %163 = vsyncadd [#allocation4], 4294967280 }
 0x1c7   :  { %108 = sfence }
 0x1c8   :  { %109 = vsyncpa [#allocation3], 1 }
 0x1c9   :  { %110 = vsyncpa [#allocation4], 1 }

</bundles_post_ra>
